<compile_context>
chip_gen: v7x
topology: tpu7x:2x2x1
jax: 0.10.0
libtpu: 0.0.40
codegen_flags: <defaults>
</compile_context>

<pallas_src>
import jax
import jax.numpy as jnp
from jax.experimental import pallas as pl
from jax.experimental.pallas import tpu as pltpu


def _round_up(x, m):
    return (x + m - 1) // m * m


def policy_kernel(x_ref, w1_ref, b1_ref, w2_ref, b2_ref, o_ref):
    # x_ref : [TB, F] f32   w1_ref : [F, H] bf16   b1_ref : [1, H] f32
    # w2_ref: [H, A]  bf16  b2_ref : [1, A] f32    o_ref  : [TB, A] f32
    x = x_ref[...].astype(jnp.bfloat16)

    # linear1 (bf16 MXU, f32 accumulate) + bias + ReLU in f32.
    h = jnp.dot(x, w1_ref[...], preferred_element_type=jnp.float32) + b1_ref[...]
    h = jnp.maximum(h, 0.0)

    # linear2 (bf16 MXU, f32 accumulate) + bias in f32.
    logits = jnp.dot(h.astype(jnp.bfloat16), w2_ref[...],
                     preferred_element_type=jnp.float32) + b2_ref[...]

    # Row-wise numerically stable log-softmax (all f32).
    m = jnp.max(logits, axis=-1, keepdims=True)
    lse = m + jnp.log(jnp.sum(jnp.exp(logits - m), axis=-1, keepdims=True))
    o_ref[...] = logits - lse


def make_policy_params(w1, b1, w2, b2):
    """One-time preprocessing (hoisted out of the inference hot path).
    w1: (hidden, in_features), b1: (hidden,), w2: (num_actions, hidden),
    b2: (num_actions,)  -- PyTorch nn.Linear convention."""
    hidden = w1.shape[0]
    num_actions = w2.shape[0]
    w1_t = jnp.asarray(w1, jnp.float32).T.astype(jnp.bfloat16)     # (F, H)  bf16
    b1_r = jnp.asarray(b1, jnp.float32).reshape(1, hidden)         # (1, H)  f32
    w2_t = jnp.asarray(w2, jnp.float32).T.astype(jnp.bfloat16)     # (H, A)  bf16
    b2_r = jnp.asarray(b2, jnp.float32).reshape(1, num_actions)    # (1, A)  f32
    return (w1_t, b1_r, w2_t, b2_r)


def _pick_batch_tile(B):
    # B < 8   : full-batch block (block dim == array dim is legal), grid = 1.
    # 8..15   : TB = 8 (sublane multiple).
    # B >= 16 : at least 2 grid steps (so both v7x TCs get work), up to 512
    #           rows/step to amortize per-step pipeline overhead.
    if B < 8:
        return B
    if B < 16:
        return 8
    return min(512, _round_up(pl.cdiv(B, 2), 8))


@jax.jit
def policy_forward_batched(x, w1_t, b1_r, w2_t, b2_r):
    """x: [B, in_features] -> log-probs [B, num_actions].

    NOTE: jit retraces (and Mosaic recompiles) for every distinct B; if batch
    size fluctuates in an RL loop, bucket B at the call site (e.g. powers of
    two) so recompiles don't dominate wall-clock.
    """
    B, F_ = x.shape
    H = w1_t.shape[1]
    A = w2_t.shape[1]
    x = x.astype(jnp.float32)

    TB = _pick_batch_tile(B)
    grid = (pl.cdiv(B, TB),)

    flops = 2 * B * (F_ * H + H * A)
    transcendentals = B * (A + 1)                        # exp + log per row
    bytes_accessed = (4 * B * F_ + 2 * (F_ * H + H * A)  # x f32, weights bf16
                      + 4 * (H + A) + 4 * B * A)         # biases + output f32

    return pl.pallas_call(
        policy_kernel,
        out_shape=jax.ShapeDtypeStruct((B, A), jnp.float32),
        grid=grid,
        in_specs=[
            pl.BlockSpec((TB, F_), lambda i: (i, 0)),   # states, tiled over batch
            pl.BlockSpec((F_, H), lambda i: (0, 0)),    # w1 (VMEM-resident, bf16)
            pl.BlockSpec((1, H), lambda i: (0, 0)),     # b1 (f32)
            pl.BlockSpec((H, A), lambda i: (0, 0)),     # w2 (VMEM-resident, bf16)
            pl.BlockSpec((1, A), lambda i: (0, 0)),     # b2 (f32)
        ],
        out_specs=pl.BlockSpec((TB, A), lambda i: (i, 0)),
        compiler_params=pltpu.CompilerParams(
            dimension_semantics=("parallel",)),          # v7x: shard batch over 2 TCs
        cost_estimate=pl.CostEstimate(
            flops=flops, transcendentals=transcendentals,
            bytes_accessed=bytes_accessed),
    )(x, w1_t, b1_r, w2_t, b2_r)
    # If in_features / hidden ever grow to the thousands, add a K-axis grid +
    # f32 VMEM accumulator so the weights need not be fully VMEM-resident
    # (relevant for v7x's 64 MiB VMEM); at F=H=32 everything trivially fits.


def policy_forward(state, params):
    """PyTorch-equivalent forward: flattens `state` (state.view(-1)) and
    returns 1-D log-probabilities of shape (num_actions,)."""
    w1_t, b1_r, w2_t, b2_r = params
    x = state.reshape(1, -1)
    return policy_forward_batched(x, w1_t, b1_r, w2_t, b2_r)[0]


def _reference(states_2d, w1, b1, w2, b2):
    h = jnp.maximum(states_2d @ w1.T + b1, 0.0)
    logits = h @ w2.T + b2
    return jax.nn.log_softmax(logits, axis=-1)


if __name__ == "__main__":
    in_features = 32
    hidden_size = 32
    num_actions = 8

    key = jax.random.PRNGKey(0)
    k_state, k_b4, k_b20, k_w1, k_b1, k_w2, k_b2 = jax.random.split(key, 7)

    # Single "state" shaped (2, 16) -> flattened to in_features=32 (like view(-1)).
    state = jax.random.normal(k_state, (2, 16), dtype=jnp.float32)
    # Small batches of flattened states; 20 rows exercises the ragged 2-step grid.
    batch4 = jax.random.normal(k_b4, (4, in_features), dtype=jnp.float32)
    batch20 = jax.random.normal(k_b20, (20, in_features), dtype=jnp.float32)

    # Deterministic init mimicking nn.Linear (uniform +/- 1/sqrt(fan_in)).
    bound1 = 1.0 / jnp.sqrt(jnp.float32(in_features))
    bound2 = 1.0 / jnp.sqrt(jnp.float32(hidden_size))
    w1 = jax.random.uniform(k_w1, (hidden_size, in_features), jnp.float32, -bound1, bound1)
    b1 = jax.random.uniform(k_b1, (hidden_size,), jnp.float32, -bound1, bound1)
    w2 = jax.random.uniform(k_w2, (num_actions, hidden_size), jnp.float32, -bound2, bound2)
    b2 = jax.random.uniform(k_b2, (num_actions,), jnp.float32, -bound2, bound2)

    # One-time parameter prep (hoisted out of the per-call hot path).
    params = make_policy_params(w1, b1, w2, b2)

    # bf16 matmul inputs (f32 accumulation + f32 log-softmax) -> relaxed
    # tolerance vs. the all-f32 reference.
    TOL = dict(atol=3e-2, rtol=3e-2)

    # Single-state forward (matches PyTorch module semantics).
    out1 = policy_forward(state, params)
    jax.block_until_ready(out1)
    ref1 = _reference(state.reshape(1, -1), w1, b1, w2, b2)[0]
    assert out1.shape == (num_actions,)
    assert jnp.allclose(out1, ref1, **TOL), (out1, ref1)
    assert jnp.allclose(jnp.sum(jnp.exp(out1)), 1.0, atol=1e-4)

    # Batched forwards: single-block grid (B=4) and ragged multi-block grid (B=20).
    for batch in (batch4, batch20):
        out_b = policy_forward_batched(batch, *params)
        jax.block_until_ready(out_b)
        ref_b = _reference(batch, w1, b1, w2, b2)
        assert out_b.shape == (batch.shape[0], num_actions)
        assert jnp.allclose(out_b, ref_b, **TOL), (out_b, ref_b)
        assert jnp.allclose(jnp.sum(jnp.exp(out_b), axis=-1),
                            jnp.ones(batch.shape[0]), atol=1e-4)

    print("KERNEL_OK")
</pallas_src>

<mosaic_0001>
module attributes {stable_mosaic.version = 11 : i64} {
  func.func @policy_kernel(%arg0: i32, %arg1: memref<1x32xf32, #tpu.memory_space<vmem>>, %arg2: memref<32x32xbf16, #tpu.memory_space<vmem>>, %arg3: memref<1x32xf32, #tpu.memory_space<vmem>>, %arg4: memref<32x8xbf16, #tpu.memory_space<vmem>>, %arg5: memref<1x8xf32, #tpu.memory_space<vmem>>, %arg6: memref<1x8xf32, #tpu.memory_space<vmem>>) attributes {dimension_semantics = [#tpu.dimension_semantics<parallel>], iteration_bounds = array<i64: 1>, scalar_prefetch = 0 : i64, scratch_operands = 0 : i64, tpu.core_type = #tpu.core_type<tc>, window_params = [{transform_indices = @transform_0, window_bounds = array<i64: 1, 32>}, {pipeline_mode = #tpu.pipeline_mode<synchronous>, transform_indices = @transform_1, window_bounds = array<i64: 32, 32>}, {pipeline_mode = #tpu.pipeline_mode<synchronous>, transform_indices = @transform_2, window_bounds = array<i64: 1, 32>}, {pipeline_mode = #tpu.pipeline_mode<synchronous>, transform_indices = @transform_3, window_bounds = array<i64: 32, 8>}, {pipeline_mode = #tpu.pipeline_mode<synchronous>, transform_indices = @transform_4, window_bounds = array<i64: 1, 8>}, {transform_indices = @transform_5, window_bounds = array<i64: 1, 8>}]} {
    %c0 = arith.constant 0 : index
    %c0_0 = arith.constant 0 : index
    %0 = vector.load %arg1[%c0, %c0_0] : memref<1x32xf32, #tpu.memory_space<vmem>>, vector<1x32xf32>
    %1 = arith.truncf %0 : vector<1x32xf32> to vector<1x32xbf16>
    %c0_1 = arith.constant 0 : index
    %c0_2 = arith.constant 0 : index
    %2 = vector.load %arg2[%c0_1, %c0_2] : memref<32x32xbf16, #tpu.memory_space<vmem>>, vector<32x32xbf16>
    %cst = arith.constant dense<0.000000e+00> : vector<1x32xf32>
    %3 = tpu.matmul %1, %2, %cst {dimension_numbers = #tpu.dot_dimension_numbers<[1], [0], [0], [1], [0, 0, 1, 1], [], []>} : vector<1x32xbf16>, vector<32x32xbf16>, vector<1x32xf32> -> vector<1x32xf32>
    %c0_3 = arith.constant 0 : index
    %c0_4 = arith.constant 0 : index
    %4 = vector.load %arg3[%c0_3, %c0_4] : memref<1x32xf32, #tpu.memory_space<vmem>>, vector<1x32xf32>
    %5 = arith.addf %3, %4 : vector<1x32xf32>
    %cst_5 = arith.constant 0.000000e+00 : f32
    %6 = vector.broadcast %cst_5 : f32 to vector<1x32xf32>
    %7 = arith.maximumf %5, %6 : vector<1x32xf32>
    %8 = arith.truncf %7 : vector<1x32xf32> to vector<1x32xbf16>
    %c0_6 = arith.constant 0 : index
    %c0_7 = arith.constant 0 : index
    %9 = vector.load %arg4[%c0_6, %c0_7] : memref<32x8xbf16, #tpu.memory_space<vmem>>, vector<32x8xbf16>
    %cst_8 = arith.constant dense<0.000000e+00> : vector<1x8xf32>
    %10 = tpu.matmul %8, %9, %cst_8 {dimension_numbers = #tpu.dot_dimension_numbers<[1], [0], [0], [1], [0, 0, 1, 1], [], []>} : vector<1x32xbf16>, vector<32x8xbf16>, vector<1x8xf32> -> vector<1x8xf32>
    %c0_9 = arith.constant 0 : index
    %c0_10 = arith.constant 0 : index
    %11 = vector.load %arg5[%c0_9, %c0_10] : memref<1x8xf32, #tpu.memory_space<vmem>>, vector<1x8xf32>
    %12 = arith.addf %10, %11 : vector<1x8xf32>
    %cst_11 = arith.constant dense<0xFF800000> : vector<1xf32>
    %13 = vector.multi_reduction <maximumf>, %12, %cst_11 [1] : vector<1x8xf32> to vector<1xf32>
    %14 = vector.shape_cast %13 : vector<1xf32> to vector<1x1xf32>
    %15 = vector.broadcast %14 : vector<1x1xf32> to vector<1x8xf32>
    %16 = arith.subf %12, %15 : vector<1x8xf32>
    %17 = math.exp %16 : vector<1x8xf32>
    %cst_12 = arith.constant dense<0.000000e+00> : vector<1xf32>
    %18 = vector.multi_reduction <add>, %17, %cst_12 [1] : vector<1x8xf32> to vector<1xf32>
    %19 = vector.shape_cast %18 : vector<1xf32> to vector<1x1xf32>
    %20 = math.log %19 : vector<1x1xf32>
    %21 = arith.addf %14, %20 : vector<1x1xf32>
    %22 = vector.broadcast %21 : vector<1x1xf32> to vector<1x8xf32>
    %23 = arith.subf %12, %22 : vector<1x8xf32>
    %c0_13 = arith.constant 0 : index
    %c0_14 = arith.constant 0 : index
    %24 = vector.load %arg6[%c0_13, %c0_14] : memref<1x8xf32, #tpu.memory_space<vmem>>, vector<1x8xf32>
    tpu.vector_store %arg6[%c0_13, %c0_14], %23 {strides = array<i32>} : memref<1x8xf32, #tpu.memory_space<vmem>>, vector<1x8xf32>,
    return
  }
  func.func @transform_0(%arg0: i32) -> (i32, i32) {
    %c0_i32 = arith.constant 0 : i32
    %c0_i32_0 = arith.constant 0 : i32
    return %arg0, %c0_i32 : i32, i32
  }
  func.func @transform_1(%arg0: i32) -> (i32, i32) {
    %c0_i32 = arith.constant 0 : i32
    %c0_i32_0 = arith.constant 0 : i32
    %c0_i32_1 = arith.constant 0 : i32
    return %c0_i32, %c0_i32_0 : i32, i32
  }
  func.func @transform_2(%arg0: i32) -> (i32, i32) {
    %c0_i32 = arith.constant 0 : i32
    %c0_i32_0 = arith.constant 0 : i32
    %c0_i32_1 = arith.constant 0 : i32
    return %c0_i32, %c0_i32_0 : i32, i32
  }
  func.func @transform_3(%arg0: i32) -> (i32, i32) {
    %c0_i32 = arith.constant 0 : i32
    %c0_i32_0 = arith.constant 0 : i32
    %c0_i32_1 = arith.constant 0 : i32
    return %c0_i32, %c0_i32_0 : i32, i32
  }
  func.func @transform_4(%arg0: i32) -> (i32, i32) {
    %c0_i32 = arith.constant 0 : i32
    %c0_i32_0 = arith.constant 0 : i32
    %c0_i32_1 = arith.constant 0 : i32
    return %c0_i32, %c0_i32_0 : i32, i32
  }
  func.func @transform_5(%arg0: i32) -> (i32, i32) {
    %c0_i32 = arith.constant 0 : i32
    %c0_i32_0 = arith.constant 0 : i32
    return %arg0, %c0_i32 : i32, i32
  }
}

</mosaic_0001>

<bundles_post_ra>
// kernel: policy_forward_batched.1
= control target key start
LH: loop header
LB: loop body
LE: loop exit
PB: predicated region body
PF: predicated region fallthrough
CT: control target
= control target key end

     0   :  { %v239_v1 = vmov 0.0   ;;  %vm240_vm0 = vmmov 0   ;;  %s308_s0 = inlined_call_operand.vmem [shape: f32[1,32], index: 0, kind: input, shape index: {}]   ;;  %s309_s1 = inlined_call_operand.vmem [shape: bf16[32,32], index: 1, kind: input, shape index: {}]   ;;  %s310_s2 = inlined_call_operand.vmem [shape: f32[1,32], index: 2, kind: input, shape index: {}]   ;;  %s311_s3 = inlined_call_operand.vmem [shape: bf16[32,8], index: 3, kind: input, shape index: {}]   ;;  %s312_s4 = inlined_call_operand.vmem [shape: f32[1,8], index: 4, kind: input, shape index: {}]   ;;  %s313_s5 = inlined_call_operand.hbm [shape: f32[1,8], index: 5, kind: output, shape index: {}]  }
   0x1   :  { %v207_v0 = vld [vmem:[%s309_s1] sm:$0xff]   ;;  %188 = vmatprep.subr.bf16.mxu0 %v239_v1  ;;  %196 = vmatprep.subr.bf16.mxu1 %v239_v1  ;;  %v208_v2 = vld [vmem:[%s309_s1 + $0x8] sm:$0xff]  }
   0x2   :  { %189 = vmatpush3.bf16.msra.mxu0 %v207_v0  ;;  %192 = vmatprep.mubr.msk.bf16.mxu0 %vm240_vm0, %v239_v1  ;;  %v22_v3 = vld [vmem:[%s308_s0] sm:$0x1] }
   0x3   :  { %190 = vmatprep.subr.bf16.mxu0 %v239_v1  ;;  %200 = vmatprep.mubr.msk.bf16.mxu1 %vm240_vm0, %v239_v1 }
   0x4   :  { %10 = vsyncpa [#allocation3], 0  ;;  %v23_v4 = vpack.c.bf16 %v22_v3, %v22_v3  ;;  %vm41_vm1 = vcmask 261120   ;;  %v209_v5 = vld [vmem:[%s311_s3] sm:$0xff]   ;;  %v210_v6 = vld [vmem:[%s311_s3 + $0x8] sm:$0xff]   ;;  %vm147_vm2 = vcmask 57344  }
   0x5   :  { %197 = vmatpush3.bf16.msra.mxu1 %v209_v5  ;;  %v28_v7 = vld [vmem:[%s310_s2] sm:$0x1]  ;;  %s241_s2 = smov [#allocation2]  }
   0x6   :  { %191 = vmatpush3.bf16.msra.mxu0 %v208_v2  ;;  %198 = vmatprep.subr.bf16.mxu1 %v239_v1  ;;  %v91_v15 = vld [vmem:[%s312_s4] sm:$0x1]  ;;  %s168_s3 = sshll.u32 %s241_s2, 4  ;;  %s169_s3 = int_to_ptr.vmem [resolvable:$true] %s168_s3 }
   0x7   :  { %s215_s4 = scalar_lea.vmem %s169_s3, 16  ;;  %s219_s30 = scalar_lea.vmem %s169_s3, 32 }
   0x8   :  { %p216_p0 = scmp.ne.s32.totalorder %s169_s3, %s215_s4  ;;  %p220_p1 = scmp.lt.s32.totalorder %s169_s3, %s169_s3 }
   0x9   :  { %193 = vmatmul.mubr.msk.bf16.vlgmr.msra.gmra.mrb[0].mxu0 %vm41_vm1, %v23_v4  ;;  %199 = vmatpush3.bf16.msra.mxu1 %v210_v6  ;;  %p221_p2 = scmp.lt.s32.totalorder %s219_s30, %s215_s4 }
   0xb   :  { %p222_p3 = por %p221_p2, %p220_p1 }
   0xd   :  { %p223_p4 = pnand %p222_p3, %p216_p0 }
  0xdc   :  { %v79_v8 = vpop.f32.mrb[0].mxu0 }
  0xdd   :  { %v80_v9 = vadd.f32 %v79_v8, %v28_v7  ;;  %v194_v10 = vpop.f32.mrb[1].mxu0 }
  0xde   :  { %v82_v11 = vpop.f32.mrb[2].mxu0 }
  0xdf   :  { %v85_v12 = vmax.f32 %v80_v9, 0.0  ;;  %v195_v13 = vpop.f32.mrb[3].mxu0 }
  0xe1   :  { %v86_v14 = vpack.c.bf16 %v85_v12, %v85_v12 }
  0xe3   :  { %201 = vmatmul.mubr.msk.bf16.vlgmr.msra.gmra.mrb[0].mxu1 %vm41_vm1, %v86_v14 }
 0x1b6   :  { %v141_v16 = vpop.f32.mrb[0].mxu1 }
 0x1b7   :  { %v142_v17 = vadd.f32 %v141_v16, %v91_v15  ;;  %v202_v18 = vpop.f32.mrb[1].mxu1 }
 0x1b8   :  { %v144_v19 = vpop.f32.mrb[2].mxu1 }
 0x1b9   :  { %v203_v20 = vpop.f32.mrb[3].mxu1  ;;  %v148_v21 = vsel %vm147_vm2, %v142_v17, -inf }
 0x1ba   :  { %149 = vmax.xlane.f32.xlu0 %v148_v21 }
 0x247   :  { %v150_v22 = vpop.xlane.xlu0 %149 }
 0x248   :  { %v151_v23 = vsub.f32 %v142_v17, %v150_v22 }
 0x24a   :  { %v152_v24 = vmul.f32 1.442695, %v151_v23 }
 0x24c   :  { %211 = vpow2.f32 %v152_v24 }
 0x256   :  { %v212_v25 = vpop.eup %211 }
 0x257   :  { %v154_v26 = vsel %vm147_vm2, %v212_v25, 0.0 }
 0x258   :  { %155 = vadd.xlane.f32.xlu0 %v154_v26 }
 0x2e5   :  { %v156_v27 = vpop.xlane.xlu0 %155 }
 0x2e6   :  { %213 = vlog2.f32 %v156_v27 }
 0x2f0   :  { %v214_v28 = vpop.eup %213 }
 0x2f1   :  { %v158_v29 = vmul.f32 0.6931472, %v214_v28 }
 0x2f3   :  { %v159_v30 = vadd.f32 %v158_v29, %v150_v22 }
 0x2f5   :  { %v160_v31 = vsub.f32 %v142_v17, %v159_v30 }
 0x2f7   :  { %161 = vst.msk [vmem:[#allocation2] sm:$0x1] %vm147_vm2, %v160_v31 }
 0x2f8   :  { %226 = shalt.err (!%p223_p4)
}
 0x2f9   :  { %s227_s8 = scalar_lea.hbm %s313_s5, 16 }
 0x2fa   :  { %p228_p5 = scmp.ne.s32.totalorder %s313_s5, %s227_s8  ;;  %p231_p6 = scmp.lt.u32.totalorder %s227_s8, %s313_s5 }
 0x2fc   :  { %p233_p7 = pnand %p231_p6, %p228_p5 }
 0x2fe   :  { %236 = shalt.err (!%p233_p7)
}
 0x2ff   :  { %171 = dma.vmem_to_hbm [thread:$0]  %s169_s3, 16, %s313_s5, [#allocation3]  }
 0x300   :  { %237 = dma.done.wait [#allocation3], 16  }
 0x301   :  { %238 = vsyncadd [#allocation3], 4294967280 }
 0x302   :  { %175 = vsyncpa [#allocation3], 1 }

</bundles_post_ra>
